<compile_context>
chip_gen: v7x
topology: tpu7x:2x2x1
jax: 0.10.0
libtpu: 0.0.40
codegen_flags: <defaults>
</compile_context>

<pallas_src>
import jax
import jax.numpy as jnp
import numpy as np
from jax.experimental import pallas as pl
from jax.experimental.pallas import tpu as pltpu

EPS = 1e-5


def _round_up(v, m):
    return ((v + m - 1) // m) * m


# ------------------------------ Pallas kernel ------------------------------ #

def _make_fused_bottleneck_kernel(H, W, NB, G, C1, Cpad, mxu_dtype):
    HW = H * W
    Cout = G + C1
    taps = [(dy, dx) for dy in range(3) for dx in range(3)]

    def kernel(x_ref, s1_ref, b1_ref, s2_ref, b2_ref, w1_ref, w2_ref, m_ref,
               o_ref, col_ref):
        # x_ref  : (NB, Cin, HW)  channels on sublanes, H*W on lanes
        # s1,b1  : (Cin, 1)       folded BN1 scale / shift
        # s2,b2  : (Cpad, 1)      folded BN2 scale / shift (rows [G:G+C1])
        # w1     : (Cpad, Cin)    rows [G:G+C1] = conv1 weight^T, rest 0
        # w2     : (Cpad, 9*Cpad) rows [:G] = conv2 taps in im2col layout
        # m_ref  : (9, HW)        1.0 where the tap's source pixel is in-image
        # o_ref  : (NB, Cout, HW) fused concat output [res ; y]
        # col_ref: (9*Cpad, HW)   VMEM im2col staging buffer
        s1 = s1_ref[...]
        b1 = b1_ref[...]
        s2 = s2_ref[...]
        b2 = b2_ref[...]
        w1 = w1_ref[...]
        w2 = w2_ref[...]

        for i in range(NB):                    # static unroll (NB kept small)
            x = x_ref[i]                                           # (Cin, HW)
            t = jnp.maximum(x * s1 + b1, 0.0)                      # BN1 + ReLU

            # conv1 (1x1) + concat: rows [G:G+C1] of acc = y = w1^T @ t.
            acc = jnp.dot(w1, t.astype(mxu_dtype),
                          preferred_element_type=jnp.float32)      # (Cpad, HW)

            # BN2 + ReLU straight off the accumulator (no second conv1 dot);
            # rows outside [G:G+C1] stay exactly 0 (zero scale/shift rows).
            a = jnp.maximum(acc * s2 + b2, 0.0)                    # (Cpad, HW)

            # im2col: 9 lane-rolled + masked copies -> one wide contraction.
            for k, (dy, dx) in enumerate(taps):
                shift = ((1 - dy) * W + (1 - dx)) % HW
                win = a if shift == 0 else pltpu.roll(a, shift=shift, axis=1)
                if not (dy == 1 and dx == 1):
                    win = win * m_ref[k:k + 1, :]
                col_ref[k * Cpad:(k + 1) * Cpad, :] = win.astype(mxu_dtype)

            # conv2 (3x3) accumulates into output rows [:G]; rows [G:] of w2
            # are zero so the concatenated conv1 output is untouched.
            acc = acc + jnp.dot(w2, col_ref[...],
                                preferred_element_type=jnp.float32)
            o_ref[i] = acc[:Cout, :]

    return kernel


# --------------------------------- Wrapper ---------------------------------- #

def bottleneck_block_forward(x_nchw, params, *, nb=1, use_bf16_mxu=False):
    """Equivalent of bottleneck_block.forward (PyTorch). NCHW in / NCHW out."""
    x_nchw = x_nchw.astype(jnp.float32)
    N, Cin, H, W = x_nchw.shape
    HW = H * W
    w1 = params["w1"].astype(jnp.float32)             # (Cin, C1)
    w2 = params["w2"].astype(jnp.float32)             # (3, 3, C1, G)
    C1 = w1.shape[1]
    G = w2.shape[3]
    Cout = G + C1
    Cpad = _round_up(Cout, 8)                         # sublane-aligned channels
    mxu_dtype = jnp.bfloat16 if use_bf16_mxu else jnp.float32
    assert N % nb == 0, (N, nb)

    # ---- one-time parameter glue: fold eval-mode BN, build augmented weights.
    s1 = (params["gamma1"] / jnp.sqrt(params["var1"] + EPS)).reshape(Cin, 1)
    b1 = params["beta1"].reshape(Cin, 1) - params["mean1"].reshape(Cin, 1) * s1
    s2 = params["gamma2"] / jnp.sqrt(params["var2"] + EPS)
    b2 = params["beta2"] - params["mean2"] * s2
    s2p = jnp.zeros((Cpad, 1), jnp.float32).at[G:G + C1, 0].set(s2)
    b2p = jnp.zeros((Cpad, 1), jnp.float32).at[G:G + C1, 0].set(b2)
    # conv1 + concat: acc rows [G:G+C1] <- w1^T @ t.
    w1_aug = jnp.zeros((Cpad, Cin), jnp.float32).at[G:G + C1, :].set(w1.T)
    # conv2 + concat: output rows [:G] <- 3x3 taps in im2col column layout.
    w2_aug = jnp.zeros((Cpad, 9 * Cpad), jnp.float32)
    for dy in range(3):
        for dx in range(3):
            k = dy * 3 + dx
            w2_aug = w2_aug.at[:G, k * Cpad + G:k * Cpad + G + C1].set(
                w2[dy, dx].T)
    w1_aug = w1_aug.astype(mxu_dtype)
    w2_aug = w2_aug.astype(mxu_dtype)

    # Per-tap validity masks, hoisted out of the kernel body.
    pos = jnp.arange(HW, dtype=jnp.int32)
    hh, ww = pos // W, pos % W
    rows = []
    for dy in range(3):
        for dx in range(3):
            valid = ((hh + dy - 1 >= 0) & (hh + dy - 1 < H) &
                     (ww + dx - 1 >= 0) & (ww + dx - 1 < W))
            rows.append(valid.astype(jnp.float32))
    mask = jnp.stack(rows, axis=0)                    # (9, HW)

    # ---- layout: NCHW -> (N, C, HW) is a pure reshape (no transpose).
    x2 = x_nchw.reshape(N, Cin, HW)

    kernel = _make_fused_bottleneck_kernel(H, W, nb, G, C1, Cpad, mxu_dtype)

    out2 = pl.pallas_call(
        kernel,
        grid=(N // nb,),
        in_specs=[
            pl.BlockSpec((nb, Cin, HW), lambda n: (n, 0, 0)),
            pl.BlockSpec((Cin, 1), lambda n: (0, 0)),
            pl.BlockSpec((Cin, 1), lambda n: (0, 0)),
            pl.BlockSpec((Cpad, 1), lambda n: (0, 0)),
            pl.BlockSpec((Cpad, 1), lambda n: (0, 0)),
            pl.BlockSpec((Cpad, Cin), lambda n: (0, 0)),
            pl.BlockSpec((Cpad, 9 * Cpad), lambda n: (0, 0)),
            pl.BlockSpec((9, HW), lambda n: (0, 0)),
        ],
        out_specs=pl.BlockSpec((nb, Cout, HW), lambda n: (n, 0, 0)),
        out_shape=jax.ShapeDtypeStruct((N, Cout, HW), jnp.float32),
        scratch_shapes=[pltpu.VMEM((9 * Cpad, HW), mxu_dtype)],
        compiler_params=pltpu.CompilerParams(
            dimension_semantics=("parallel",),
            vmem_limit_bytes=32 * 1024 * 1024),
    )(x2, s1, b1, s2p, b2p, w1_aug, w2_aug, mask)

    # (N, Cout, HW) -> NCHW is again a pure reshape (channel order = [res; y]).
    return out2.reshape(N, Cout, H, W)


# --------------------------- Params & reference ----------------------------- #

def init_params(key, in_planes, growth_rate):
    c1 = 4 * growth_rate
    ks = jax.random.split(key, 8)
    bound1 = (1.0 / (in_planes * 1 * 1)) ** 0.5
    bound2 = (1.0 / (c1 * 3 * 3)) ** 0.5
    return {
        # PyTorch conv1.weight (4g, Cin, 1, 1) -> stored as (Cin, 4g)
        "w1": jax.random.uniform(ks[0], (in_planes, c1), jnp.float32,
                                 -bound1, bound1),
        # PyTorch conv2.weight (g, 4g, 3, 3) -> stored as (3, 3, 4g, g)
        "w2": jax.random.uniform(ks[1], (3, 3, c1, growth_rate), jnp.float32,
                                 -bound2, bound2),
        "gamma1": jax.random.uniform(ks[2], (in_planes,), jnp.float32, 0.5, 1.5),
        "beta1": 0.1 * jax.random.normal(ks[3], (in_planes,), jnp.float32),
        "mean1": 0.1 * jax.random.normal(ks[4], (in_planes,), jnp.float32),
        "var1": jax.random.uniform(ks[5], (in_planes,), jnp.float32, 0.5, 1.5),
        "gamma2": jax.random.uniform(ks[6], (c1,), jnp.float32, 0.5, 1.5),
        "beta2": 0.1 * jax.random.normal(ks[7], (c1,), jnp.float32),
        "mean2": jnp.zeros((c1,), jnp.float32),
        "var2": jnp.ones((c1,), jnp.float32),
    }


def ref_forward(x_nchw, p):
    """Pure-JAX NCHW reference with identical math (for validation)."""
    x = x_nchw.astype(jnp.float32)
    N, Cin, H, W = x.shape
    s1 = p["gamma1"] / jnp.sqrt(p["var1"] + EPS)
    b1 = p["beta1"] - p["mean1"] * s1
    t = jnp.maximum(x * s1[None, :, None, None] + b1[None, :, None, None], 0.0)
    y = jnp.einsum("co,nchw->nohw", p["w1"], t,
                   precision=jax.lax.Precision.HIGHEST)
    s2 = p["gamma2"] / jnp.sqrt(p["var2"] + EPS)
    b2 = p["beta2"] - p["mean2"] * s2
    a = jnp.maximum(y * s2[None, :, None, None] + b2[None, :, None, None], 0.0)
    ap = jnp.pad(a, ((0, 0), (0, 0), (1, 1), (1, 1)))
    G = p["w2"].shape[3]
    res = jnp.zeros((N, G, H, W), jnp.float32)
    for dy in range(3):
        for dx in range(3):
            res = res + jnp.einsum("cg,nchw->nghw", p["w2"][dy, dx],
                                   ap[:, :, dy:dy + H, dx:dx + W],
                                   precision=jax.lax.Precision.HIGHEST)
    return jnp.concatenate([res, y], axis=1)


# ----------------------------------- Main ----------------------------------- #

if __name__ == "__main__":
    N, in_planes, growth_rate, H, W = 2, 8, 4, 16, 16

    key = jax.random.PRNGKey(0)
    kx, kp = jax.random.split(key)
    x = jax.random.normal(kx, (N, in_planes, H, W), jnp.float32)   # NCHW input
    params = init_params(kp, in_planes, growth_rate)

    fwd = jax.jit(lambda xx, pp: bottleneck_block_forward(xx, pp))
    out = jax.block_until_ready(fwd(x, params))

    expected_shape = (N, growth_rate + 4 * growth_rate, H, W)
    assert out.shape == expected_shape, (out.shape, expected_shape)

    ref = jax.block_until_ready(ref_forward(x, params))
    np.testing.assert_allclose(np.asarray(out), np.asarray(ref),
                               rtol=5e-4, atol=5e-4)

    print("KERNEL_OK")
</pallas_src>

<mosaic_0001>
module attributes {stable_mosaic.version = 11 : i64} {
  func.func @kernel(%arg0: i32, %arg1: memref<1x8x256xf32, #tpu.memory_space<vmem>>, %arg2: memref<8x1xf32, #tpu.memory_space<vmem>>, %arg3: memref<8x1xf32, #tpu.memory_space<vmem>>, %arg4: memref<24x1xf32, #tpu.memory_space<vmem>>, %arg5: memref<24x1xf32, #tpu.memory_space<vmem>>, %arg6: memref<24x8xf32, #tpu.memory_space<vmem>>, %arg7: memref<24x216xf32, #tpu.memory_space<vmem>>, %arg8: memref<9x256xf32, #tpu.memory_space<vmem>>, %arg9: memref<1x20x256xf32, #tpu.memory_space<vmem>>, %arg10: memref<216x256xf32, #tpu.memory_space<vmem>>) attributes {dimension_semantics = [#tpu.dimension_semantics<parallel>], iteration_bounds = array<i64: 2>, scalar_prefetch = 0 : i64, scratch_operands = 1 : i64, tpu.core_type = #tpu.core_type<tc>, window_params = [{transform_indices = @transform_0, window_bounds = array<i64: 1, 8, 256>}, {pipeline_mode = #tpu.pipeline_mode<synchronous>, transform_indices = @transform_1, window_bounds = array<i64: 8, 1>}, {pipeline_mode = #tpu.pipeline_mode<synchronous>, transform_indices = @transform_2, window_bounds = array<i64: 8, 1>}, {pipeline_mode = #tpu.pipeline_mode<synchronous>, transform_indices = @transform_3, window_bounds = array<i64: 24, 1>}, {pipeline_mode = #tpu.pipeline_mode<synchronous>, transform_indices = @transform_4, window_bounds = array<i64: 24, 1>}, {pipeline_mode = #tpu.pipeline_mode<synchronous>, transform_indices = @transform_5, window_bounds = array<i64: 24, 8>}, {pipeline_mode = #tpu.pipeline_mode<synchronous>, transform_indices = @transform_6, window_bounds = array<i64: 24, 216>}, {pipeline_mode = #tpu.pipeline_mode<synchronous>, transform_indices = @transform_7, window_bounds = array<i64: 9, 256>}, {transform_indices = @transform_8, window_bounds = array<i64: 1, 20, 256>}]} {
    %c0 = arith.constant 0 : index
    %c0_0 = arith.constant 0 : index
    %0 = vector.load %arg2[%c0, %c0_0] : memref<8x1xf32, #tpu.memory_space<vmem>>, vector<8x1xf32>
    %c0_1 = arith.constant 0 : index
    %c0_2 = arith.constant 0 : index
    %1 = vector.load %arg3[%c0_1, %c0_2] : memref<8x1xf32, #tpu.memory_space<vmem>>, vector<8x1xf32>
    %c0_3 = arith.constant 0 : index
    %c0_4 = arith.constant 0 : index
    %2 = vector.load %arg4[%c0_3, %c0_4] : memref<24x1xf32, #tpu.memory_space<vmem>>, vector<24x1xf32>
    %c0_5 = arith.constant 0 : index
    %c0_6 = arith.constant 0 : index
    %3 = vector.load %arg5[%c0_5, %c0_6] : memref<24x1xf32, #tpu.memory_space<vmem>>, vector<24x1xf32>
    %c0_7 = arith.constant 0 : index
    %c0_8 = arith.constant 0 : index
    %4 = vector.load %arg6[%c0_7, %c0_8] : memref<24x8xf32, #tpu.memory_space<vmem>>, vector<24x8xf32>
    %c0_9 = arith.constant 0 : index
    %c0_10 = arith.constant 0 : index
    %5 = vector.load %arg7[%c0_9, %c0_10] : memref<24x216xf32, #tpu.memory_space<vmem>>, vector<24x216xf32>
    %c0_11 = arith.constant 0 : index
    %c0_12 = arith.constant 0 : index
    %c0_13 = arith.constant 0 : index
    %6 = vector.load %arg1[%c0_11, %c0_12, %c0_13] : memref<1x8x256xf32, #tpu.memory_space<vmem>>, vector<1x8x256xf32>
    %7 = vector.shape_cast %6 : vector<1x8x256xf32> to vector<8x256xf32>
    %8 = vector.broadcast %0 : vector<8x1xf32> to vector<8x256xf32>
    %9 = arith.mulf %7, %8 : vector<8x256xf32>
    %10 = vector.broadcast %1 : vector<8x1xf32> to vector<8x256xf32>
    %11 = arith.addf %9, %10 : vector<8x256xf32>
    %cst = arith.constant 0.000000e+00 : f32
    %12 = vector.broadcast %cst : f32 to vector<8x256xf32>
    %13 = arith.maximumf %11, %12 : vector<8x256xf32>
    %cst_14 = arith.constant dense<0.000000e+00> : vector<24x256xf32>
    %14 = tpu.matmul %4, %13, %cst_14 {dimension_numbers = #tpu.dot_dimension_numbers<[1], [0], [0], [1], [0, 0, 1, 1], [], []>} : vector<24x8xf32>, vector<8x256xf32>, vector<24x256xf32> -> vector<24x256xf32>
    %15 = vector.broadcast %2 : vector<24x1xf32> to vector<24x256xf32>
    %16 = arith.mulf %14, %15 : vector<24x256xf32>
    %17 = vector.broadcast %3 : vector<24x1xf32> to vector<24x256xf32>
    %18 = arith.addf %16, %17 : vector<24x256xf32>
    %cst_15 = arith.constant 0.000000e+00 : f32
    %19 = vector.broadcast %cst_15 : f32 to vector<24x256xf32>
    %20 = arith.maximumf %18, %19 : vector<24x256xf32>
    %c17_i32 = arith.constant 17 : i32
    %21 = tpu.dynamic_rotate %20 by %c17_i32 dim 1 : vector<24x256xf32>, i32 -> vector<24x256xf32>
    %c0_16 = arith.constant 0 : index
    %c0_17 = arith.constant 0 : index
    %22 = vector.load %arg8[%c0_16, %c0_17] : memref<9x256xf32, #tpu.memory_space<vmem>>, vector<1x256xf32>
    %23 = vector.broadcast %22 : vector<1x256xf32> to vector<24x256xf32>
    %24 = arith.mulf %21, %23 : vector<24x256xf32>
    %c0_18 = arith.constant 0 : index
    %c0_19 = arith.constant 0 : index
    %25 = vector.load %arg10[%c0_18, %c0_19] : memref<216x256xf32, #tpu.memory_space<vmem>>, vector<24x256xf32>
    tpu.vector_store %arg10[%c0_18, %c0_19], %24 {strides = array<i32>} : memref<216x256xf32, #tpu.memory_space<vmem>>, vector<24x256xf32>,
    %c16_i32 = arith.constant 16 : i32
    %26 = tpu.dynamic_rotate %20 by %c16_i32 dim 1 : vector<24x256xf32>, i32 -> vector<24x256xf32>
    %c1 = arith.constant 1 : index
    %c0_20 = arith.constant 0 : index
    %27 = vector.load %arg8[%c1, %c0_20] : memref<9x256xf32, #tpu.memory_space<vmem>>, vector<1x256xf32>
    %28 = vector.broadcast %27 : vector<1x256xf32> to vector<24x256xf32>
    %29 = arith.mulf %26, %28 : vector<24x256xf32>
    %c24 = arith.constant 24 : index
    %c0_21 = arith.constant 0 : index
    %30 = vector.load %arg10[%c24, %c0_21] : memref<216x256xf32, #tpu.memory_space<vmem>>, vector<24x256xf32>
    tpu.vector_store %arg10[%c24, %c0_21], %29 {strides = array<i32>} : memref<216x256xf32, #tpu.memory_space<vmem>>, vector<24x256xf32>,
    %c15_i32 = arith.constant 15 : i32
    %31 = tpu.dynamic_rotate %20 by %c15_i32 dim 1 : vector<24x256xf32>, i32 -> vector<24x256xf32>
    %c2 = arith.constant 2 : index
    %c0_22 = arith.constant 0 : index
    %32 = vector.load %arg8[%c2, %c0_22] : memref<9x256xf32, #tpu.memory_space<vmem>>, vector<1x256xf32>
    %33 = vector.broadcast %32 : vector<1x256xf32> to vector<24x256xf32>
    %34 = arith.mulf %31, %33 : vector<24x256xf32>
    %c48 = arith.constant 48 : index
    %c0_23 = arith.constant 0 : index
    %35 = vector.load %arg10[%c48, %c0_23] : memref<216x256xf32, #tpu.memory_space<vmem>>, vector<24x256xf32>
    tpu.vector_store %arg10[%c48, %c0_23], %34 {strides = array<i32>} : memref<216x256xf32, #tpu.memory_space<vmem>>, vector<24x256xf32>,
    %c1_i32 = arith.constant 1 : i32
    %36 = tpu.dynamic_rotate %20 by %c1_i32 dim 1 : vector<24x256xf32>, i32 -> vector<24x256xf32>
    %c3 = arith.constant 3 : index
    %c0_24 = arith.constant 0 : index
    %37 = vector.load %arg8[%c3, %c0_24] : memref<9x256xf32, #tpu.memory_space<vmem>>, vector<1x256xf32>
    %38 = vector.broadcast %37 : vector<1x256xf32> to vector<24x256xf32>
    %39 = arith.mulf %36, %38 : vector<24x256xf32>
    %c72 = arith.constant 72 : index
    %c0_25 = arith.constant 0 : index
    %40 = vector.load %arg10[%c72, %c0_25] : memref<216x256xf32, #tpu.memory_space<vmem>>, vector<24x256xf32>
    tpu.vector_store %arg10[%c72, %c0_25], %39 {strides = array<i32>} : memref<216x256xf32, #tpu.memory_space<vmem>>, vector<24x256xf32>,
    %c96 = arith.constant 96 : index
    %c0_26 = arith.constant 0 : index
    %41 = vector.load %arg10[%c96, %c0_26] : memref<216x256xf32, #tpu.memory_space<vmem>>, vector<24x256xf32>
    tpu.vector_store %arg10[%c96, %c0_26], %20 {strides = array<i32>} : memref<216x256xf32, #tpu.memory_space<vmem>>, vector<24x256xf32>,
    %c255_i32 = arith.constant 255 : i32
    %42 = tpu.dynamic_rotate %20 by %c255_i32 dim 1 : vector<24x256xf32>, i32 -> vector<24x256xf32>
    %c5 = arith.constant 5 : index
    %c0_27 = arith.constant 0 : index
    %43 = vector.load %arg8[%c5, %c0_27] : memref<9x256xf32, #tpu.memory_space<vmem>>, vector<1x256xf32>
    %44 = vector.broadcast %43 : vector<1x256xf32> to vector<24x256xf32>
    %45 = arith.mulf %42, %44 : vector<24x256xf32>
    %c120 = arith.constant 120 : index
    %c0_28 = arith.constant 0 : index
    %46 = vector.load %arg10[%c120, %c0_28] : memref<216x256xf32, #tpu.memory_space<vmem>>, vector<24x256xf32>
    tpu.vector_store %arg10[%c120, %c0_28], %45 {strides = array<i32>} : memref<216x256xf32, #tpu.memory_space<vmem>>, vector<24x256xf32>,
    %c241_i32 = arith.constant 241 : i32
    %47 = tpu.dynamic_rotate %20 by %c241_i32 dim 1 : vector<24x256xf32>, i32 -> vector<24x256xf32>
    %c6 = arith.constant 6 : index
    %c0_29 = arith.constant 0 : index
    %48 = vector.load %arg8[%c6, %c0_29] : memref<9x256xf32, #tpu.memory_space<vmem>>, vector<1x256xf32>
    %49 = vector.broadcast %48 : vector<1x256xf32> to vector<24x256xf32>
    %50 = arith.mulf %47, %49 : vector<24x256xf32>
    %c144 = arith.constant 144 : index
    %c0_30 = arith.constant 0 : index
    %51 = vector.load %arg10[%c144, %c0_30] : memref<216x256xf32, #tpu.memory_space<vmem>>, vector<24x256xf32>
    tpu.vector_store %arg10[%c144, %c0_30], %50 {strides = array<i32>} : memref<216x256xf32, #tpu.memory_space<vmem>>, vector<24x256xf32>,
    %c240_i32 = arith.constant 240 : i32
    %52 = tpu.dynamic_rotate %20 by %c240_i32 dim 1 : vector<24x256xf32>, i32 -> vector<24x256xf32>
    %c7 = arith.constant 7 : index
    %c0_31 = arith.constant 0 : index
    %53 = vector.load %arg8[%c7, %c0_31] : memref<9x256xf32, #tpu.memory_space<vmem>>, vector<1x256xf32>
    %54 = vector.broadcast %53 : vector<1x256xf32> to vector<24x256xf32>
    %55 = arith.mulf %52, %54 : vector<24x256xf32>
    %c168 = arith.constant 168 : index
    %c0_32 = arith.constant 0 : index
    %56 = vector.load %arg10[%c168, %c0_32] : memref<216x256xf32, #tpu.memory_space<vmem>>, vector<24x256xf32>
    tpu.vector_store %arg10[%c168, %c0_32], %55 {strides = array<i32>} : memref<216x256xf32, #tpu.memory_space<vmem>>, vector<24x256xf32>,
    %c239_i32 = arith.constant 239 : i32
    %57 = tpu.dynamic_rotate %20 by %c239_i32 dim 1 : vector<24x256xf32>, i32 -> vector<24x256xf32>
    %c8 = arith.constant 8 : index
    %c0_33 = arith.constant 0 : index
    %58 = vector.load %arg8[%c8, %c0_33] : memref<9x256xf32, #tpu.memory_space<vmem>>, vector<1x256xf32>
    %59 = vector.broadcast %58 : vector<1x256xf32> to vector<24x256xf32>
    %60 = arith.mulf %57, %59 : vector<24x256xf32>
    %c192 = arith.constant 192 : index
    %c0_34 = arith.constant 0 : index
    %61 = vector.load %arg10[%c192, %c0_34] : memref<216x256xf32, #tpu.memory_space<vmem>>, vector<24x256xf32>
    tpu.vector_store %arg10[%c192, %c0_34], %60 {strides = array<i32>} : memref<216x256xf32, #tpu.memory_space<vmem>>, vector<24x256xf32>,
    %c0_35 = arith.constant 0 : index
    %c0_36 = arith.constant 0 : index
    %62 = vector.load %arg10[%c0_35, %c0_36] : memref<216x256xf32, #tpu.memory_space<vmem>>, vector<216x256xf32>
    %cst_37 = arith.constant dense<0.000000e+00> : vector<24x256xf32>
    %63 = tpu.matmul %5, %62, %cst_37 {dimension_numbers = #tpu.dot_dimension_numbers<[1], [0], [0], [1], [0, 0, 1, 1], [], []>} : vector<24x216xf32>, vector<216x256xf32>, vector<24x256xf32> -> vector<24x256xf32>
    %64 = arith.addf %14, %63 : vector<24x256xf32>
    %65 = vector.extract_strided_slice %64 {offsets = [0, 0], sizes = [20, 256], strides = [1, 1]} : vector<24x256xf32> to vector<20x256xf32>
    %c0_38 = arith.constant 0 : index
    %c0_39 = arith.constant 0 : index
    %c0_40 = arith.constant 0 : index
    %66 = vector.load %arg9[%c0_38, %c0_39, %c0_40] : memref<1x20x256xf32, #tpu.memory_space<vmem>>, vector<1x20x256xf32>
    %67 = vector.shape_cast %66 : vector<1x20x256xf32> to vector<20x256xf32>
    %68 = vector.shape_cast %65 : vector<20x256xf32> to vector<1x20x256xf32>
    tpu.vector_store %arg9[%c0_38, %c0_39, %c0_40], %68 {strides = array<i32>} : memref<1x20x256xf32, #tpu.memory_space<vmem>>, vector<1x20x256xf32>,
    return
  }
  func.func @transform_0(%arg0: i32) -> (i32, i32, i32) {
    %c0_i32 = arith.constant 0 : i32
    %c0_i32_0 = arith.constant 0 : i32
    %c0_i32_1 = arith.constant 0 : i32
    return %arg0, %c0_i32, %c0_i32_0 : i32, i32, i32
  }
  func.func @transform_1(%arg0: i32) -> (i32, i32) {
    %c0_i32 = arith.constant 0 : i32
    %c0_i32_0 = arith.constant 0 : i32
    %c0_i32_1 = arith.constant 0 : i32
    return %c0_i32, %c0_i32_0 : i32, i32
  }
  func.func @transform_2(%arg0: i32) -> (i32, i32) {
    %c0_i32 = arith.constant 0 : i32
    %c0_i32_0 = arith.constant 0 : i32
    %c0_i32_1 = arith.constant 0 : i32
    return %c0_i32, %c0_i32_0 : i32, i32
  }
  func.func @transform_3(%arg0: i32) -> (i32, i32) {
    %c0_i32 = arith.constant 0 : i32
    %c0_i32_0 = arith.constant 0 : i32
    %c0_i32_1 = arith.constant 0 : i32
    return %c0_i32, %c0_i32_0 : i32, i32
  }
  func.func @transform_4(%arg0: i32) -> (i32, i32) {
    %c0_i32 = arith.constant 0 : i32
    %c0_i32_0 = arith.constant 0 : i32
    %c0_i32_1 = arith.constant 0 : i32
    return %c0_i32, %c0_i32_0 : i32, i32
  }
  func.func @transform_5(%arg0: i32) -> (i32, i32) {
    %c0_i32 = arith.constant 0 : i32
    %c0_i32_0 = arith.constant 0 : i32
    %c0_i32_1 = arith.constant 0 : i32
    return %c0_i32, %c0_i32_0 : i32, i32
  }
  func.func @transform_6(%arg0: i32) -> (i32, i32) {
    %c0_i32 = arith.constant 0 : i32
    %c0_i32_0 = arith.constant 0 : i32
    %c0_i32_1 = arith.constant 0 : i32
    return %c0_i32, %c0_i32_0 : i32, i32
  }
  func.func @transform_7(%arg0: i32) -> (i32, i32) {
    %c0_i32 = arith.constant 0 : i32
    %c0_i32_0 = arith.constant 0 : i32
    %c0_i32_1 = arith.constant 0 : i32
    return %c0_i32, %c0_i32_0 : i32, i32
  }
  func.func @transform_8(%arg0: i32) -> (i32, i32, i32) {
    %c0_i32 = arith.constant 0 : i32
    %c0_i32_0 = arith.constant 0 : i32
    %c0_i32_1 = arith.constant 0 : i32
    return %arg0, %c0_i32, %c0_i32_0 : i32, i32, i32
  }
}

</mosaic_0001>

<bundles_post_ra>
// kernel: _lambda_.1
= control target key start
LH: loop header
LB: loop body
LE: loop exit
PB: predicated region body
PF: predicated region fallthrough
CT: control target
= control target key end

     0   :  { %s1243_s27 = smov 0   ;;  %s1646_s0 = inlined_call_operand.vmem [shape: f32[2,8,256], index: 0, kind: input, shape index: {}]   ;;  %s1647_s1 = inlined_call_operand.vmem [shape: f32[8,1], index: 1, kind: input, shape index: {}]   ;;  %s1648_s2 = inlined_call_operand.vmem [shape: f32[8,1], index: 2, kind: input, shape index: {}]   ;;  %s1649_s3 = inlined_call_operand.vmem [shape: f32[24,1], index: 3, kind: input, shape index: {}]   ;;  %s1650_s4 = inlined_call_operand.vmem [shape: f32[24,1], index: 4, kind: input, shape index: {}]   ;;  %s1651_s5 = inlined_call_operand.vmem [shape: f32[24,8], index: 5, kind: input, shape index: {}]   ;;  %s1652_s6 = inlined_call_operand.vmem [shape: f32[24,216], index: 6, kind: input, shape index: {}]   ;;  %s1653_s7 = inlined_call_operand.vmem [shape: f32[9,256], index: 7, kind: input, shape index: {}]   ;;  %s1654_s8 = inlined_call_operand.vmem [shape: f32[2,20,256], index: 8, kind: output, shape index: {}]  }
   0x1 LB: > { %s1055_s28 = sadd.s32 4294967295, %s1186_s27   ;;  %p1059_p0 = scmp.ge.s32.totalorder %s1186_s27, 1  ;;  %s1186_s27 = sphi %s1243_s27, %s18_s27  }
   0x2   : > { %p262_p1 = scmp.lt.s32.totalorder %s1186_s27, 3 }
   0x4   : > { %p263_p2 = pnand %p1059_p0, %p262_p1 }
   0x5   : > { %v306_v0 = vld [vmem:[%s1647_s1] sm:$0xff] (!%p263_p2)  ;;  %v1188_v1 = vmov (!%p263_p2), 0   ;;  %v310_v4 = vld [vmem:[%s1649_s3 + $0x10] sm:$0xff] (!%p263_p2)  ;;  %v1189_v5 = vmov (!%p263_p2), 0.0   ;;  %v309_v7 = vld [vmem:[%s1649_s3 + $0x8] sm:$0xff] (!%p263_p2)  ;;  %p296_p3 = scmp.lt.s32.totalorder (!%p263_p2), %s1055_s28, 1  ;;  %v494_v59 = vlaneseq (!%p263_p2) }
   0x6   : > { %266 = sbr.rel (%p263_p2) target bundleno = 798 (0x31e), region = 52  ;;  %1178 = vset.pattern.permute.xlu0 (!%p263_p2), %v1188_v1  ;;  %1179 = vset.pattern.permute.xlu1 (!%p263_p2), %v1188_v1  ;;  %v307_v2 = vld [vmem:[%s1648_s2] sm:$0xff] (!%p263_p2)  ;;  %v312_v8 = vld [vmem:[%s1650_s4 + $0x8] sm:$0xff] (!%p263_p2)  ;;  %v313_v9 = vld [vmem:[%s1650_s4 + $0x10] sm:$0xff] (!%p263_p2)  ;;  %vm341_vm0 = vcmask (!%p263_p2), 64512   ;;  %s1190_s13 = smov (!%p263_p2), 17  }
   0x7   : > { %327 = vperm.xlu0 (!%p263_p2), %1178, %v306_v0   ;;  %v311_v3 = vld [vmem:[%s1650_s4] sm:$0xff] (!%p263_p2)  ;;  %415 = vmatprep.mubr.f32.mxu0 (!%p263_p2), %v1189_v5  ;;  %v315_v21 = vld [vmem:[%s1651_s5 + $0x8] sm:$0xff] (!%p263_p2)  ;;  %v316_v22 = vld [vmem:[%s1651_s5 + $0x10] sm:$0xff] (!%p263_p2)  ;;  %s1191_s14 = smov (!%p263_p2), 16   ;;  %s1192_s15 = smov (!%p263_p2), 1   ;;  %vm895_vm1 = vcmask (!%p263_p2), 719872  }
   0x8   : > { %v308_v6 = vld [vmem:[%s1649_s3] sm:$0xff] (!%p263_p2)  ;;  %s1193_s16 = smov (!%p263_p2), 15   ;;  %s1194_s17 = smov (!%p263_p2), 127   ;;  %v318_v53 = vld [vmem:[%s1652_s6 + $0x8] sm:$0xff] (!%p263_p2)  ;;  %v320_v54 = vld [vmem:[%s1652_s6 + $0x18] sm:$0xff] (!%p263_p2)  ;;  %v506_v62 = vshrl.u32 (!%p263_p2), %v494_v59, 7 }
   0x9   : > { %436 = vperm.xlu1 (!%p263_p2), %1179, %v308_v6   ;;  %v314_v20 = vld [vmem:[%s1651_s5] sm:$0xff] (!%p263_p2)  ;;  %s1195_s18 = smov (!%p263_p2), 113   ;;  %s1196_s19 = smov (!%p263_p2), 112   ;;  %1074 = vmatprep.mubr.msk.f32.mxu1 (!%p263_p2), %vm895_vm1, %v320_v54 }
   0xa   : > { %s1197_s20 = smov (!%p263_p2), 111   ;;  %v503_v1 = vld [vmem:[%s1653_s7] ss:$8 sm:$0x3] (!%p263_p2) }
   0xb   : > { %334 = vperm.xlu0 (!%p263_p2), %1178, %v307_v2   ;;  %v1421_v2 = vand.u32 (!%p263_p2), 127, %v494_v59 }
   0xd   : > { %441 = vperm.xlu1 %1179, %v309_v7   ;;  %s1656_s28 = smov (!%p296_p3, %s1055_s28), 1  ;;  %vm496_vm2 = vcmp.lt.s32.totalorder %v1421_v2, 17  ;;  %vm539_vm3 = vcmp.lt.s32.totalorder %v1421_v2, 16  ;;  %vm583_vm4 = vcmp.lt.s32.totalorder %v1421_v2, 15  ;;  %vm627_vm5 = vcmp.lt.s32.totalorder %v1421_v2, 1 }
   0xe   : > { %s1078_s23 = sshll.u32 %s1656_s28, 4  ;;  %vm677_vm6 = vcmp.lt.s32.totalorder %v1421_v2, 127  ;;  %vm721_vm7 = vcmp.lt.s32.totalorder %v1421_v2, 113  ;;  %vm765_vm8 = vcmp.lt.s32.totalorder %v1421_v2, 112  ;;  %vm809_vm9 = vcmp.lt.s32.totalorder %v1421_v2, 111  ;;  %v322_v2 = vld [vmem:[%s1652_s6 + $0x28] sm:$0xff] }
   0xf   : > { %457 = vperm.xlu0 %1178, %v311_v3   ;;  %s300_s26 = scalar_lea.vmem %s1646_s0, %s1078_s23  ;;  %v1423_v3 = vsub.s32 0, %v506_v62  ;;  %s1159_s9 = smul.u32 48, %s1656_s28 }
  0x10   : > { %v323_v11 = vld [vmem:[%s300_s26] sm:$0xff]  ;;  %v324_v12 = vld [vmem:[%s300_s26 + $0x8] sm:$0xff] }
  0x11   : > { %462 = vperm.xlu1 %1179, %v312_v8   ;;  %v508_v7 = vrot.slane %v503_v1, %v1423_v3  ;;  %s305_s12 = scalar_lea.vmem %s1654_s8, %s1159_s9 }
  0x13   : > { %446 = vperm.xlu0 %1178, %v310_v4   ;;  %v1425_v4 = vsub.s32 1, %v506_v62 }
  0x15   : > { %467 = vperm.xlu1 %1179, %v313_v9   ;;  %v512_v8 = vrot.slane %v503_v1, %v1425_v4 }
  0x86   : > { %v328_v10 = vpop.permute.xlu0 %327 }
  0x87   : > { %v330_v13 = vmul.f32 %v328_v10, %v323_v11  ;;  %v331_v14 = vmul.f32 %v328_v10, %v324_v12 }
  0x88   : > { %v437_v23 = vpop.permute.xlu1 %436 }
  0x8a   : > { %v335_v15 = vpop.permute.xlu0 %334 }
  0x8b   : > { %v337_v16 = vadd.f32 %v335_v15, %v330_v13  ;;  %v338_v17 = vadd.f32 %v335_v15, %v331_v14 }
  0x8c   : > { %v442_v35 = vpop.permute.xlu1 %441 }
  0x8d   : > { %v340_v18 = vmax.f32 %v338_v17, 0.0  ;;  %v339_v19 = vmax.f32 %v337_v16, 0.0 }
  0x8e   : > { %v458_v27 = vpop.permute.xlu0 %457 }
  0x8f   : > { %351 = vmatprep.subr.mxu0 %v340_v18 }
  0x90   : > { %352 = vmatpush1.msra.mxu0 %v339_v19  ;;  %v463_v39 = vpop.permute.xlu1 %462 }
  0x91   : > { %1063 = vmatmul.mubr.msk.f32.vlgmr.msra.gmra.mrb[0].mxu0 %vm341_vm0, %v314_v20 }
  0x92   : > { %421 = vmatprep.mubr.f32.mxu0 %v1189_v5  ;;  %v447_v44 = vpop.permute.xlu0 %446 }
  0x94   : > { %v468_v47 = vpop.permute.xlu1 %467 }
  0x95   : > { %1064 = vmatmul.mubr.msk.f32.gmra.mrb[2].mxu0 %vm341_vm0, %v315_v21 }
  0x96   : > { %427 = vmatprep.mubr.f32.mxu0 %v1189_v5 }
  0x99   : > { %1065 = vmatmul.mubr.msk.f32.gmra.mrb[4].mxu0 %vm341_vm0, %v316_v22 }
  0x9a   : > { %1073 = vmatprep.mubr.msk.f32.mxu0 %vm895_vm1, %v318_v53 }
 0x164   : > { %v1290_v24 = vpop.f32.mrb[0].mxu0 }
 0x165   : > { %v449_v25 = vmul.f32 %v437_v23, %v1290_v24  ;;  %v1293_v26 = vpop.f32.mrb[1].mxu0 }
 0x166   : > { %v450_v28 = vmul.f32 %v437_v23, %v1293_v26 }
 0x167   : > { %v470_v29 = vadd.f32 %v458_v27, %v449_v25 }
 0x168   : > { %v471_v30 = vadd.f32 %v458_v27, %v450_v28  ;;  %v1296_v31 = vpop.f32.mrb[2].mxu0 }
 0x169   : > { %v1298_v32 = vmax.f32 %v470_v29, 0.0  ;;  %v1300_v33 = vpop.f32.mrb[3].mxu0  ;;  %v451_v38 = vmul.f32 %v442_v35, %v1296_v31 }
 0x16a   : > { %v1302_v34 = vmax.f32 %v471_v30, 0.0  ;;  %v452_v42 = vmul.f32 %v442_v35, %v1300_v33  ;;  %v1066_v35 = vld [vmem:[%s1653_s7 + $0x1] ss:$8 sm:$0x3] }
 0x16b   : > { %482 = vrot.lane.b32.xlu0 %v1298_v32, %s1190_s13  ;;  %v472_v40 = vadd.f32 %v463_v39, %v451_v38 }
 0x16c   : > { %533 = vrot.lane.b32.xlu1 %v1302_v34, %s1191_s14  ;;  %v1308_v36 = vpop.f32.mrb[4].mxu0  ;;  %v473_v43 = vadd.f32 %v463_v39, %v452_v42  ;;  %v552_v39 = vrot.slane %v1066_v35, %v1423_v3  ;;  %v556_v42 = vrot.slane %v1066_v35, %v1425_v4 }
 0x16d   : > { %v1310_v37 = vpop.f32.mrb[5].mxu0  ;;  %v1321_v41 = vmax.f32 %v472_v40, 0.0  ;;  %v453_v46 = vmul.f32 %v447_v44, %v1308_v36 }
 0x16e   : > { %v1332_v45 = vmax.f32 %v473_v43, 0.0  ;;  %v454_v50 = vmul.f32 %v447_v44, %v1310_v37  ;;  %v1067_v44 = vld [vmem:[%s1653_s7 + $0x2] ss:$8 sm:$0x3] }
 0x16f   : > { %527 = vrot.lane.b32.xlu0 %v1298_v32, %s1191_s14  ;;  %v474_v48 = vadd.f32 %v468_v47, %v453_v46  ;;  %v596_v1 = vrot.slane %v1067_v44, %v1423_v3 }
 0x170   : > { %621 = vrot.lane.b32.xlu1 %v1302_v34, %s1192_s15  ;;  %v475_v51 = vadd.f32 %v468_v47, %v454_v50  ;;  %v600_v50 = vrot.slane %v1067_v44, %v1425_v4 }
 0x171   : > { %v1343_v49 = vmax.f32 %v474_v48, 0.0 }
 0x172   : > { %v1362_v52 = vmax.f32 %v475_v51, 0.0 }
 0x173   : > { %571 = vrot.lane.b32.xlu0 %v1298_v32, %s1193_s16 }
 0x174   : > { %671 = vrot.lane.b32.xlu1 %v1302_v34, %s1194_s17 }
 0x177   : > { %615 = vrot.lane.b32.xlu0 %v1298_v32, %s1192_s15 }
 0x178   : > { %484 = vrot.lane.b32.xlu1 %v1321_v41, %s1190_s13 }
 0x17b   : > { %665 = vrot.lane.b32.xlu0 %v1298_v32, %s1194_s17 }
 0x17c   : > { %573 = vrot.lane.b32.xlu1 %v1321_v41, %s1193_s16 }
 0x17f   : > { %488 = vrot.lane.b32.xlu0 %v1302_v34, %s1190_s13 }
 0x180   : > { %490 = vrot.lane.b32.xlu1 %v1332_v45, %s1190_s13 }
 0x183   : > { %577 = vrot.lane.b32.xlu0 %v1302_v34, %s1193_s16 }
 0x184   : > { %579 = vrot.lane.b32.xlu1 %v1332_v45, %s1193_s16 }
 0x187   : > { %529 = vrot.lane.b32.xlu0 %v1321_v41, %s1191_s14 }
 0x188   : > { %531 = vrot.lane.b32.xlu1 %v1343_v49, %s1191_s14 }
 0x18b   : > { %617 = vrot.lane.b32.xlu0 %v1321_v41, %s1192_s15 }
 0x18c   : > { %711 = vrot.lane.b32.xlu1 %v1321_v41, %s1195_s18 }
 0x18f   : > { %535 = vrot.lane.b32.xlu0 %v1332_v45, %s1191_s14 }
 0x190   : > { %619 = vrot.lane.b32.xlu1 %v1343_v49, %s1192_s15 }
 0x193   : > { %623 = vrot.lane.b32.xlu0 %v1332_v45, %s1192_s15 }
 0x194   : > { %669 = vrot.lane.b32.xlu1 %v1343_v49, %s1194_s17 }
 0x197   : > { %486 = vrot.lane.b32.xlu0 %v1343_v49, %s1190_s13 }
 0x198   : > { %492 = vrot.lane.b32.xlu1 %v1362_v52, %s1190_s13 }
 0x19b   : > { %667 = vrot.lane.b32.xlu0 %v1321_v41, %s1194_s17 }
 0x19c   : > { %537 = vrot.lane.b32.xlu1 %v1362_v52, %s1191_s14 }
 0x19f   : > { %673 = vrot.lane.b32.xlu0 %v1332_v45, %s1194_s17 }
 0x1a0   : > { %717 = vrot.lane.b32.xlu1 %v1332_v45, %s1195_s18 }
 0x1a3   : > { %575 = vrot.lane.b32.xlu0 %v1343_v49, %s1193_s16 }
 0x1a4   : > { %581 = vrot.lane.b32.xlu1 %v1362_v52, %s1193_s16 }
 0x1a7   : > { %709 = vrot.lane.b32.xlu0 %v1298_v32, %s1195_s18 }
 0x1a8   : > { %625 = vrot.lane.b32.xlu1 %v1362_v52, %s1192_s15 }
 0x1ab   : > { %715 = vrot.lane.b32.xlu0 %v1302_v34, %s1195_s18 }
 0x1ac   : > { %759 = vrot.lane.b32.xlu1 %v1302_v34, %s1196_s19 }
 0x1af   : > { %713 = vrot.lane.b32.xlu0 %v1343_v49, %s1195_s18 }
 0x1b0   : > { %757 = vrot.lane.b32.xlu1 %v1343_v49, %s1196_s19 }
 0x1b3   : > { %753 = vrot.lane.b32.xlu0 %v1298_v32, %s1196_s19 }
 0x1b4   : > { %675 = vrot.lane.b32.xlu1 %v1362_v52, %s1194_s17 }
 0x1b7   : > { %755 = vrot.lane.b32.xlu0 %v1321_v41, %s1196_s19 }
 0x1b8   : > { %799 = vrot.lane.b32.xlu1 %v1321_v41, %s1197_s20 }
 0x1bb   : > { %761 = vrot.lane.b32.xlu0 %v1332_v45, %s1196_s19 }
 0x1bc   : > { %719 = vrot.lane.b32.xlu1 %v1362_v52, %s1195_s18 }
 0x1bf   : > { %797 = vrot.lane.b32.xlu0 %v1298_v32, %s1197_s20 }
 0x1c0   : > { %763 = vrot.lane.b32.xlu1 %v1362_v52, %s1196_s19 }
 0x1c3   : > { %803 = vrot.lane.b32.xlu0 %v1302_v34, %s1197_s20 }
 0x1c4   : > { %805 = vrot.lane.b32.xlu1 %v1332_v45, %s1197_s20 }
 0x1c7   : > { %801 = vrot.lane.b32.xlu0 %v1343_v49, %s1197_s20 }
 0x1c8   : > { %807 = vrot.lane.b32.xlu1 %v1362_v52, %s1197_s20 }
 0x1dd   : > { %v483_v55 = vpop.permute.xlu0 %482 }
 0x1de   : > { %v534_v56 = vpop.permute.xlu1 %533 }
 0x1e1   : > { %v528_v57 = vpop.permute.xlu0 %527 }
 0x1e2   : > { %v1412_v58 = vpop.permute.xlu1 %621  ;;  %v543_v43 = vsel %vm539_vm3, %v534_v56, %v528_v57  ;;  %v540_v46 = vsel %vm539_vm3, %v528_v57, %v534_v56 }
 0x1e3   : > { %v559_v48 = vmul.f32 %v552_v39, %v543_v43  ;;  %v560_v53 = vmul.f32 %v556_v42, %v540_v46 }
 0x1e5   : > { %v572_v60 = vpop.permute.xlu0 %571 }
 0x1e6   : > { %v1414_v61 = vpop.permute.xlu1 %671 }
 0x1e9   : > { %v1416_v63 = vpop.permute.xlu0 %615 }
 0x1ea   : > { %v485_v0 = vpop.permute.xlu1 %484  ;;  %v628_v46 = vsel %vm627_vm5, %v1416_v63, %v1412_v58 }
 0x1ed   : > { %v1427_v5 = vpop.permute.xlu0 %665 }
 0x1ee   : > { %v574_v6 = vpop.permute.xlu1 %573 }
 0x1f1   : > { %v489_v9 = vpop.permute.xlu0 %488 }
 0x1f2   : > { %v497_v10 = vsel %vm496_vm2, %v483_v55, %v489_v9  ;;  %v500_v11 = vsel %vm496_vm2, %v489_v9, %v483_v55  ;;  %v491_v12 = vpop.permute.xlu1 %490 }
 0x1f3   : > { %v515_v13 = vmul.f32 %v508_v7, %v500_v11  ;;  %v516_v14 = vmul.f32 %v512_v8, %v497_v10  ;;  %v498_v15 = vsel %vm496_vm2, %v485_v0, %v491_v12  ;;  %v501_v16 = vsel %vm496_vm2, %v491_v12, %v485_v0 }
 0x1f4   : > { %v517_v17 = vmul.f32 %v508_v7, %v501_v16  ;;  %v518_v18 = vmul.f32 %v512_v8, %v498_v15 }
 0x1f5   : > { %v578_v19 = vpop.permute.xlu0 %577 }
 0x1f6   : > { %v1081_v20 = vpack.c.bf16 %v517_v17, %v515_v13  ;;  %v580_v21 = vpop.permute.xlu1 %579  ;;  %v1079_v22 = vpack.c.bf16 %v518_v18, %v516_v14  ;;  %v584_v54 = vsel %vm583_vm4, %v572_v60, %v578_v19  ;;  %v587_v9 = vsel %vm583_vm4, %v578_v19, %v572_v60  ;;  %v1068_v18 = vld [vmem:[%s1653_s7 + $0x3] ss:$8 sm:$0x3] }
 0x1f7   : > { %v585_v56 = vsel %vm583_vm4, %v574_v6, %v580_v21  ;;  %v604_v12 = vmul.f32 %v600_v50, %v584_v54  ;;  %v588_v13 = vsel %vm583_vm4, %v580_v21, %v574_v6  ;;  %v603_v35 = vmul.f32 %v596_v1, %v587_v9 }
 0x1f8   : > { %1080 = vmatprep.subr.bf16.mxu0 %v1079_v22  ;;  %1131 = vmatprep.subr.bf16.mxu1 %v1079_v22  ;;  %v606_v17 = vmul.f32 %v600_v50, %v585_v56  ;;  %v605_v43 = vmul.f32 %v596_v1, %v588_v13  ;;  %v644_v44 = vrot.slane %v1068_v18, %v1425_v4  ;;  %v1069_v56 = vld [vmem:[%s1653_s7 + $0x5] ss:$8 sm:$0x3] }
 0x1f9   : > { %v530_v23 = vpop.permute.xlu0 %529  ;;  %1082 = vmatpush1.bf16.msra.mxu0 %v1081_v20  ;;  %1145 = vmatpush1.bf16.msra.mxu1 %v1081_v20  ;;  %v694_v13 = vrot.slane %v1069_v56, %v1425_v4 }
 0x1fa   : > { %v532_v25 = vpop.permute.xlu1 %531 }
 0x1fd   : > { %v1440_v27 = vpop.permute.xlu0 %617 }
 0x1fe   : > { %v1442_v28 = vpop.permute.xlu1 %711 }
 0x201   : > { %v536_v29 = vpop.permute.xlu0 %535 }
 0x202   : > { %v1444_v30 = vpop.permute.xlu1 %619  ;;  %v544_v57 = vsel %vm539_vm3, %v536_v29, %v530_v23  ;;  %v541_v10 = vsel %vm539_vm3, %v530_v23, %v536_v29 }
 0x203   : > { %v562_v19 = vmul.f32 %v556_v42, %v541_v10 }
 0x205   : > { %v1450_v38 = vpop.permute.xlu0 %623 }
 0x206   : > { %v1453_v40 = vpop.permute.xlu1 %669 }
 0x209   : > { %v487_v47 = vpop.permute.xlu0 %486 }
 0x20a   : > { %v493_v51 = vpop.permute.xlu1 %492 }
 0x20b   : > { %v499_v55 = vsel %vm496_vm2, %v487_v47, %v493_v51  ;;  %v502_v59 = vsel %vm496_vm2, %v493_v51, %v487_v47 }
 0x20c   : > { %v519_v62 = vmul.f32 %v508_v7, %v502_v59  ;;  %v520_v0 = vmul.f32 %v512_v8, %v499_v55  ;;  %v561_v7 = vmul.f32 %v552_v39, %v544_v57  ;;  %v648_v59 = vmul.f32 %v644_v44, %v628_v46 }
 0x20d   : > { %v1480_v11 = vpop.permute.xlu0 %667 }
 0x20e   : > { %v1085_v14 = vpack.c.bf16 %v559_v48, %v519_v62  ;;  %v538_v15 = vpop.permute.xlu1 %537  ;;  %v1083_v16 = vpack.c.bf16 %v560_v53, %v520_v0  ;;  %v1093_v53 = vpack.c.bf16 %v605_v43, %v603_v35  ;;  %v629_v62 = vsel %vm627_vm5, %v1440_v27, %v1450_v38 }
 0x20f   : > { %v542_v8 = vsel %vm539_vm3, %v532_v25, %v538_v15  ;;  %v545_v60 = vsel %vm539_vm3, %v538_v15, %v532_v25  ;;  %v640_v25 = vrot.slane %v1068_v18, %v1423_v3 }
 0x210   : > { %v563_v20 = vmul.f32 %v552_v39, %v545_v60  ;;  %v564_v22 = vmul.f32 %v556_v42, %v542_v8  ;;  %1084 = vmatprep.subr.bf16.mxu0 %v1083_v16  ;;  %1132 = vmatprep.subr.bf16.mxu1 %v1083_v16  ;;  %v631_v39 = vsel %vm627_vm5, %v1412_v58, %v1416_v63 }
 0x211   : > { %v1492_v6 = vpop.permute.xlu0 %673  ;;  %1086 = vmatpush1.bf16.msra.mxu0 %v1085_v14  ;;  %1146 = vmatpush1.bf16.msra.mxu1 %v1085_v14  ;;  %v1091_v42 = vpack.c.bf16 %v606_v17, %v604_v12  ;;  %v647_v51 = vmul.f32 %v640_v25, %v631_v39  ;;  %v632_v58 = vsel %vm627_vm5, %v1450_v38, %v1440_v27 }
 0x212   : > { %v1089_v21 = vpack.c.bf16 %v563_v20, %v561_v7  ;;  %v1494_v23 = vpop.permute.xlu1 %717  ;;  %v1087_v29 = vpack.c.bf16 %v564_v22, %v562_v19  ;;  %v649_v14 = vmul.f32 %v640_v25, %v632_v58  ;;  %v650_v27 = vmul.f32 %v644_v44, %v629_v62 }
 0x213   : > { %v681_v16 = vsel %vm677_vm6, %v1414_v61, %v1427_v5  ;;  %v690_v7 = vrot.slane %v1069_v56, %v1423_v3  ;;  %v1103_v20 = vpack.c.bf16 %v1332_v45, %v1302_v34  ;;  %v1105_v34 = vpack.c.bf16 %v1321_v41, %v1298_v32 }
 0x214   : > { %1088 = vmatprep.subr.bf16.mxu0 %v1087_v29  ;;  %1133 = vmatprep.subr.bf16.mxu1 %v1087_v29  ;;  %v698_v19 = vmul.f32 %v694_v13, %v681_v16  ;;  %v682_v45 = vsel %vm677_vm6, %v1492_v6, %v1480_v11 }
 0x215   : > { %v576_v47 = vpop.permute.xlu0 %575  ;;  %1090 = vmatpush1.bf16.msra.mxu0 %v1089_v21  ;;  %1147 = vmatpush1.bf16.msra.mxu1 %v1089_v21 }
 0x216   : > { %1092 = vmatprep.subr.bf16.mxu0 %v1091_v42  ;;  %1134 = vmatprep.subr.bf16.mxu1 %v1091_v42  ;;  %v582_v48 = vpop.permute.xlu1 %581  ;;  %v700_v42 = vmul.f32 %v694_v13, %v682_v45 }
 0x217   : > { %v586_v54 = vsel %vm583_vm4, %v576_v47, %v582_v48  ;;  %v589_v55 = vsel %vm583_vm4, %v582_v48, %v576_v47  ;;  %v1071_v47 = vld [vmem:[%s1653_s7 + $0x7] ss:$8 sm:$0x3] }
 0x218   : > { %v607_v63 = vmul.f32 %v596_v1, %v589_v55  ;;  %v608_v57 = vmul.f32 %v600_v50, %v586_v54  ;;  %v782_v62 = vrot.slane %v1071_v47, %v1425_v4 }
 0x219   : > { %v710_v0 = vpop.permute.xlu0 %709  ;;  %1094 = vmatpush1.bf16.msra.mxu0 %v1093_v53  ;;  %1148 = vmatpush1.bf16.msra.mxu1 %v1093_v53 }
 0x21a   : > { %v1097_v9 = vpack.c.bf16 %v647_v51, %v607_v63  ;;  %v626_v10 = vpop.permute.xlu1 %625  ;;  %v1095_v12 = vpack.c.bf16 %v648_v59, %v608_v57  ;;  %v778_v57 = vrot.slane %v1071_v47, %v1423_v3 }
 0x21b   : > { %v630_v50 = vsel %vm627_vm5, %v1444_v30, %v626_v10  ;;  %v633_v1 = vsel %vm627_vm5, %v626_v10, %v1444_v30  ;;  %v678_v30 = vsel %vm677_vm6, %v1427_v5, %v1414_v61  ;;  %v1070_v61 = vld [vmem:[%s1653_s7 + $0x6] ss:$8 sm:$0x3]  ;;  %v1107_v5 = vpack.c.bf16 %v698_v19, %v1362_v52 }
 0x21c   : > { %v651_v38 = vmul.f32 %v640_v25, %v633_v1  ;;  %v652_v15 = vmul.f32 %v644_v44, %v630_v50  ;;  %1096 = vmatprep.subr.bf16.mxu0 %v1095_v12  ;;  %1135 = vmatprep.subr.bf16.mxu1 %v1095_v12  ;;  %v697_v21 = vmul.f32 %v690_v7, %v678_v30 }
 0x21d   : > { %v716_v17 = vpop.permute.xlu0 %715  ;;  %1098 = vmatpush1.bf16.msra.mxu0 %v1097_v9  ;;  %1149 = vmatpush1.bf16.msra.mxu1 %v1097_v9  ;;  %v679_v25 = vsel %vm677_vm6, %v1480_v11, %v1492_v6  ;;  %v738_v32 = vrot.slane %v1070_v61, %v1425_v4  ;;  %v726_v52 = vsel %vm721_vm7, %v1494_v23, %v1442_v28 }
 0x21e   : > { %v1101_v8 = vpack.c.bf16 %v651_v38, %v649_v14  ;;  %v760_v60 = vpop.permute.xlu1 %759  ;;  %v1099_v18 = vpack.c.bf16 %v652_v15, %v650_v27  ;;  %v725_v35 = vsel %vm721_vm7, %v716_v17, %v710_v0  ;;  %v1109_v44 = vpack.c.bf16 %v697_v21, %v1343_v49  ;;  %v1072_v27 = vld [vmem:[%s1653_s7 + $0x10] ss:$8 sm:$0x3] }
 0x21f   : > { %v699_v39 = vmul.f32 %v690_v7, %v679_v25  ;;  %v722_v6 = vsel %vm721_vm7, %v710_v0, %v716_v17  ;;  %v742_v46 = vmul.f32 %v738_v32, %v725_v35  ;;  %v734_v53 = vrot.slane %v1070_v61, %v1423_v3 }
 0x220   : > { %1100 = vmatprep.subr.bf16.mxu0 %v1099_v18  ;;  %1136 = vmatprep.subr.bf16.mxu1 %v1099_v18  ;;  %v744_v55 = vmul.f32 %v738_v32, %v726_v52  ;;  %v822_v19 = vrot.slane %v1072_v27, %v1423_v3  ;;  %v826_v25 = vrot.slane %v1072_v27, %v1425_v4 }
 0x221   : > { %v714_v22 = vpop.permute.xlu0 %713  ;;  %1102 = vmatpush1.bf16.msra.mxu0 %v1101_v8  ;;  %1150 = vmatpush1.bf16.msra.mxu1 %v1101_v8  ;;  %v741_v63 = vmul.f32 %v734_v53, %v722_v6 }
 0x222   : > { %1104 = vmatprep.subr.bf16.mxu0 %v1103_v20  ;;  %1137 = vmatprep.subr.bf16.mxu1 %v1103_v20  ;;  %v1540_v29 = vpop.permute.xlu1 %757  ;;  %v1115_v9 = vpack.c.bf16 %v744_v55, %v742_v46  ;;  %v321_v55 = vld [vmem:[%s1652_s6 + $0x20] sm:$0xff] }
 0x225   : > { %v754_v43 = vpop.permute.xlu0 %753  ;;  %1106 = vmatpush1.bf16.msra.mxu0 %v1105_v34  ;;  %1151 = vmatpush1.bf16.msra.mxu1 %v1105_v34 }
 0x226   : > { %v676_v41 = vpop.permute.xlu1 %675  ;;  %1108 = vmatprep.subr.bf16.mxu0 %v1107_v5  ;;  %1138 = vmatprep.subr.bf16.mxu1 %v1107_v5  ;;  %v766_v0 = vsel %vm765_vm8, %v754_v43, %v760_v60  ;;  %v769_v12 = vsel %vm765_vm8, %v760_v60, %v754_v43 }
 0x227   : > { %v680_v11 = vsel %vm677_vm6, %v1453_v40, %v676_v41  ;;  %v683_v49 = vsel %vm677_vm6, %v676_v41, %v1453_v40  ;;  %v723_v40 = vsel %vm721_vm7, %v1442_v28, %v1494_v23  ;;  %v785_v14 = vmul.f32 %v778_v57, %v766_v0 }
 0x228   : > { %v701_v48 = vmul.f32 %v690_v7, %v680_v11  ;;  %v702_v51 = vmul.f32 %v694_v13, %v683_v49  ;;  %v743_v10 = vmul.f32 %v734_v53, %v723_v40  ;;  %v786_v38 = vmul.f32 %v782_v62, %v769_v12  ;;  %v319_v40 = vld [vmem:[%s1652_s6 + $0x10] sm:$0xff] }
 0x229   : > { %v756_v54 = vpop.permute.xlu0 %755  ;;  %1110 = vmatpush1.bf16.msra.mxu0 %v1109_v44  ;;  %1152 = vmatpush1.bf16.msra.mxu1 %v1109_v44 }
 0x22a   : > { %v1113_v59 = vpack.c.bf16 %v701_v48, %v699_v39  ;;  %v800_v56 = vpop.permute.xlu1 %799  ;;  %v1111_v58 = vpack.c.bf16 %v702_v51, %v700_v42  ;;  %v1117_v13 = vpack.c.bf16 %v743_v10, %v741_v63 }
 0x22c   : > { %1112 = vmatprep.subr.bf16.mxu0 %v1111_v58  ;;  %1139 = vmatprep.subr.bf16.mxu1 %v1111_v58 }
 0x22d   : > { %v762_v28 = vpop.permute.xlu0 %761  ;;  %1114 = vmatpush1.bf16.msra.mxu0 %v1113_v59  ;;  %1153 = vmatpush1.bf16.msra.mxu1 %v1113_v59 }
 0x22e   : > { %v720_v23 = vpop.permute.xlu1 %719  ;;  %1116 = vmatprep.subr.bf16.mxu0 %v1115_v9  ;;  %1140 = vmatprep.subr.bf16.mxu1 %v1115_v9  ;;  %v767_v15 = vsel %vm765_vm8, %v756_v54, %v762_v28  ;;  %v770_v7 = vsel %vm765_vm8, %v762_v28, %v756_v54  ;;  %v317_v54 = vld [vmem:[%s1652_s6] sm:$0xff] }
 0x22f   : > { %v724_v50 = vsel %vm721_vm7, %v714_v22, %v720_v23  ;;  %v727_v1 = vsel %vm721_vm7, %v720_v23, %v714_v22  ;;  %v787_v20 = vmul.f32 %v778_v57, %v767_v15  ;;  %v788_v61 = vmul.f32 %v782_v62, %v770_v7 }
 0x230   : > { %v745_v16 = vmul.f32 %v734_v53, %v724_v50  ;;  %v746_v17 = vmul.f32 %v738_v32, %v727_v1 }
 0x231   : > { %v798_v8 = vpop.permute.xlu0 %797  ;;  %1118 = vmatpush1.bf16.msra.mxu0 %v1117_v13  ;;  %1154 = vmatpush1.bf16.msra.mxu1 %v1117_v13 }
 0x232   : > { %v1121_v60 = vpack.c.bf16 %v785_v14, %v745_v16  ;;  %v764_v18 = vpop.permute.xlu1 %763  ;;  %v1119_v30 = vpack.c.bf16 %v786_v38, %v746_v17 }
 0x233   : > { %v768_v22 = vsel %vm765_vm8, %v1540_v29, %v764_v18  ;;  %v771_v21 = vsel %vm765_vm8, %v764_v18, %v1540_v29 }
 0x234   : > { %v789_v34 = vmul.f32 %v778_v57, %v768_v22  ;;  %v790_v45 = vmul.f32 %v782_v62, %v771_v21  ;;  %1120 = vmatprep.subr.bf16.mxu0 %v1119_v30  ;;  %1141 = vmatprep.subr.bf16.mxu1 %v1119_v30 }
 0x235   : > { %v804_v5 = vpop.permute.xlu0 %803  ;;  %1122 = vmatpush1.bf16.msra.mxu0 %v1121_v60  ;;  %1155 = vmatpush1.bf16.msra.mxu1 %v1121_v60 }
 0x236   : > { %v1125_v3 = vpack.c.bf16 %v789_v34, %v787_v20  ;;  %v810_v35 = vsel %vm809_vm9, %v798_v8, %v804_v5  ;;  %v813_v43 = vsel %vm809_vm9, %v804_v5, %v798_v8  ;;  %v806_v44 = vpop.permute.xlu1 %805  ;;  %v1123_v39 = vpack.c.bf16 %v790_v45, %v788_v61 }
 0x237   : > { %v829_v29 = vmul.f32 %v822_v19, %v810_v35  ;;  %v830_v32 = vmul.f32 %v826_v25, %v813_v43  ;;  %v811_v4 = vsel %vm809_vm9, %v800_v56, %v806_v44  ;;  %v814_v41 = vsel %vm809_vm9, %v806_v44, %v800_v56 }
 0x238   : > { %v831_v42 = vmul.f32 %v822_v19, %v811_v4  ;;  %v832_v52 = vmul.f32 %v826_v25, %v814_v41  ;;  %1124 = vmatprep.subr.bf16.mxu0 %v1123_v39  ;;  %1142 = vmatprep.subr.bf16.mxu1 %v1123_v39 }
 0x239   : > { %v802_v11 = vpop.permute.xlu0 %801  ;;  %1126 = vmatpush1.bf16.msra.mxu0 %v1125_v3  ;;  %1156 = vmatpush1.bf16.msra.mxu1 %v1125_v3 }
 0x23a   : > { %v1129_v49 = vpack.c.bf16 %v831_v42, %v829_v29  ;;  %v808_v6 = vpop.permute.xlu1 %807  ;;  %v1127_v46 = vpack.c.bf16 %v832_v52, %v830_v32 }
 0x23b   : > { %v815_v47 = vsel %vm809_vm9, %v808_v6, %v802_v11  ;;  %v812_v48 = vsel %vm809_vm9, %v802_v11, %v808_v6 }
 0x23c   : > { %v834_v51 = vmul.f32 %v826_v25, %v815_v47  ;;  %1128 = vmatprep.subr.bf16.mxu0 %v1127_v46  ;;  %1143 = vmatprep.subr.bf16.mxu1 %v1127_v46  ;;  %v833_v53 = vmul.f32 %v822_v19, %v812_v48 }
 0x23d   : > { %1130 = vmatpush1.bf16.msra.mxu0 %v1129_v49  ;;  %1157 = vmatpush1.bf16.msra.mxu1 %v1129_v49 }
 0x23e   : > { %957 = vmatprep.subr.mxu0 %v834_v51  ;;  %1144 = vmatprep.subr.mxu1 %v834_v51 }
 0x241   : > { %958 = vmatpush1.msra.mxu0 %v833_v53  ;;  %1158 = vmatpush1.msra.mxu1 %v833_v53 }
 0x242   : > { %970 = vmatmul.mubr.f32.vlgmr.msra.gmra.mrb[6].mxu0 %v317_v54  ;;  %976 = vmatmul.mubr.f32.vlgmr.msra.gmra.mrb[0].mxu1 %v319_v40 }
 0x243   : > { %1075 = vmatprep.mubr.msk.f32.mxu1 %vm895_vm1, %v322_v2 }
 0x246   : > { %982 = vmatmul.mubr.f32.gmra.mrb[2].mxu1 %v321_v55 }
 0x315   : > { %v971_v59 = vpop.f32.mrb[6].mxu0  ;;  %v977_v56 = vpop.f32.mrb[0].mxu1 }
 0x316   : > { %v988_v58 = vadd.f32 %v971_v59, %v1290_v24  ;;  %v990_v63 = vadd.f32 %v977_v56, %v1296_v31  ;;  %v973_v57 = vpop.f32.mrb[7].mxu0  ;;  %v979_v62 = vpop.f32.mrb[1].mxu1 }
 0x317   : > { %v989_v0 = vadd.f32 %v973_v57, %v1293_v26  ;;  %v991_v9 = vadd.f32 %v979_v62, %v1300_v33 }
 0x318   : > { %994 = vst [vmem:[%s305_s12] sm:$0xff] %v988_v58  ;;  %996 = vst [vmem:[%s305_s12 + $0x10] sm:$0xff] %v990_v63 }
 0x319   : > { %995 = vst [vmem:[%s305_s12 + $0x8] sm:$0xff] %v989_v0  ;;  %997 = vst [vmem:[%s305_s12 + $0x18] sm:$0xff] %v991_v9  ;;  %v983_v10 = vpop.f32.mrb[2].mxu1 }
 0x31a   : > { %v992_v12 = vadd.f32 %v983_v10, %v1308_v36  ;;  %v985_v28 = vpop.f32.mrb[3].mxu1 }
 0x31b   : > { %v993_v23 = vadd.f32 %v985_v28, %v1310_v37 }
 0x31c   : > { %998 = vst [vmem:[%s305_s12 + $0x20] sm:$0xf] %v992_v12 }
 0x31d   : > { %999 = vst [vmem:[%s305_s12 + $0x28] sm:$0xf] %v993_v23 }
 0x31e PF: > { %s18_s27 = sadd.s32 1, %s1186_s27  }
 0x31f   : > { %p15_p4 = scmp.ge.s32.totalorder %s18_s27, 4  }
 0x321   :  { %17 = sbr.rel (!%p15_p4) target bundleno = 1 (0x1), region = 89 }

</bundles_post_ra>
